<compile_context>
chip_gen: v5e
topology: v5e:2x2
jax: 0.10.0
libtpu: 0.0.40
codegen_flags: <defaults>
</compile_context>

<pallas_src>
import functools

import jax
import jax.numpy as jnp
from jax.experimental import pallas as pl
from jax.experimental.pallas import tpu as pltpu


def _layernorm_kernel(x_ref, g_ref, b_ref, o_ref, *, eps):
    x = x_ref[...].astype(jnp.float32)              # (rows, H) — f32 math in-kernel
    h = x.shape[-1]
    mean = jnp.mean(x, axis=-1, keepdims=True)
    xc = x - mean
    # torch.Tensor.std() default = unbiased (divide by H - 1).
    # H == 1 would divide by zero (torch yields NaN); we clamp the divisor so the
    # kernel stays finite and returns b_2 for that degenerate case.
    var = jnp.sum(xc * xc, axis=-1, keepdims=True) * (1.0 / max(h - 1, 1))
    denom = jnp.sqrt(var) + eps                     # eps added to std (module semantics)
    inv = pl.reciprocal(denom, approx=True)         # EUP seed (free slot)
    inv = inv * (2.0 - denom * inv)                 # one Newton step -> ~exact f32
    g = g_ref[...].astype(jnp.float32)
    b = b_ref[...].astype(jnp.float32)
    o_ref[...] = (g * (xc * inv) + b).astype(o_ref.dtype)


def layer_norm(x, gamma, beta, *, eps=1e-6, vmem_budget_bytes=12 * 1024 * 1024):
    """LayerNorm over the last dim of x, matching the PyTorch module forward."""
    orig_shape = x.shape
    h = orig_shape[-1]
    x2d = x.reshape(-1, h)                          # fold batch/seq dims; native dtype
    n = x2d.shape[0]

    g2d = gamma.reshape(1, h)
    b2d = beta.reshape(1, h)

    # Output dtype follows torch-style promotion of (x, a_2, b_2).
    out_dtype = jnp.result_type(x.dtype, gamma.dtype, beta.dtype)

    x_bytes = jnp.dtype(x.dtype).itemsize
    o_bytes = jnp.dtype(out_dtype).itemsize

    # Sublane-packing multiple for the narrowest I/O dtype (f32 -> 8, bf16 -> 16).
    row_mult = max(8, 32 // min(x_bytes, o_bytes))

    # Double-buffered pipeline footprint per row: 2x input tile + 2x output tile.
    bytes_per_row = 2 * h * x_bytes + 2 * h * o_bytes
    br = vmem_budget_bytes // max(bytes_per_row, 1)
    br = max(row_mult, (br // row_mult) * row_mult)

    if br >= n:
        br = n                      # single full-extent block: no constraint, no waste
        grid = (1,)
    else:
        grid = (pl.cdiv(n, br),)    # ragged final block handled by Pallas
                                    # (per-row op: OOB reads harmless, OOB writes dropped)

    out = pl.pallas_call(
        functools.partial(_layernorm_kernel, eps=eps),
        out_shape=jax.ShapeDtypeStruct((n, h), out_dtype),
        grid=grid,
        in_specs=[
            pl.BlockSpec((br, h), lambda i: (i, 0)),   # x rows
            pl.BlockSpec((1, h), lambda i: (0, 0)),    # gamma (a_2)
            pl.BlockSpec((1, h), lambda i: (0, 0)),    # beta  (b_2)
        ],
        out_specs=pl.BlockSpec((br, h), lambda i: (i, 0)),
        compiler_params=pltpu.CompilerParams(dimension_semantics=("parallel",)),
    )(x2d, g2d, b2d)

    return out.reshape(orig_shape[:-1] + (h,))


def layer_norm_ref(x, gamma, beta, eps=1e-6):
    """Pure-JAX replica of the PyTorch forward (unbiased std, eps on std)."""
    x = x.astype(jnp.float32)
    mean = jnp.mean(x, axis=-1, keepdims=True)
    var = jnp.sum((x - mean) ** 2, axis=-1, keepdims=True) / (x.shape[-1] - 1)
    std = jnp.sqrt(var)
    return gamma.astype(jnp.float32) * (x - mean) / (std + eps) + beta.astype(jnp.float32)


if __name__ == "__main__":
    key = jax.random.PRNGKey(0)
    k1, k2, k3, k4, k5 = jax.random.split(key, 5)

    # Case 1: small shape implied by the module (batch=2, seq=8, hidden=32),
    # non-trivial learned gamma/beta to exercise the affine path.
    B, S, H = 2, 8, 32
    x = jax.random.normal(k1, (B, S, H), jnp.float32)
    gamma = jnp.ones((H,), jnp.float32) + 0.1 * jax.random.normal(k2, (H,), jnp.float32)
    beta = 0.1 * jax.random.normal(k3, (H,), jnp.float32)

    out = jax.block_until_ready(layer_norm(x, gamma, beta))
    ref = layer_norm_ref(x, gamma, beta)
    assert out.shape == (B, S, H) and out.dtype == jnp.float32
    assert jnp.allclose(out, ref, atol=1e-4, rtol=1e-4), "mismatch vs reference (small)"

    # Case 2: larger lane-dense f32 shape (H multiple of 128); the byte-budgeted
    # block covers all 2000 rows in a single ~2 MiB tile, no padding, no extra
    # HBM passes.
    B2, S2, H2 = 4, 500, 256
    x2 = jax.random.normal(k4, (B2, S2, H2), jnp.float32)
    gamma2 = jnp.ones((H2,), jnp.float32)    # module default init (a_2)
    beta2 = jnp.zeros((H2,), jnp.float32)    # module default init (b_2)

    out2 = jax.block_until_ready(layer_norm(x2, gamma2, beta2))
    ref2 = layer_norm_ref(x2, gamma2, beta2)
    assert out2.shape == (B2, S2, H2) and out2.dtype == jnp.float32
    assert jnp.allclose(out2, ref2, atol=1e-4, rtol=1e-4), "mismatch vs reference (large)"

    # Case 3: bf16 I/O + ragged final block (n=1041 rows, small VMEM budget to
    # force multiple row blocks) — exercises the native-dtype DMA path and the
    # no-pad boundary handling.
    B3, S3, H3 = 3, 347, 256
    x3 = jax.random.normal(k5, (B3, S3, H3), jnp.float32).astype(jnp.bfloat16)
    gamma3 = jnp.ones((H3,), jnp.bfloat16)
    beta3 = jnp.zeros((H3,), jnp.bfloat16)

    out3 = jax.block_until_ready(
        layer_norm(x3, gamma3, beta3, vmem_budget_bytes=256 * 1024))
    ref3 = layer_norm_ref(x3, gamma3, beta3)
    assert out3.shape == (B3, S3, H3) and out3.dtype == jnp.bfloat16
    assert jnp.allclose(out3.astype(jnp.float32), ref3, atol=2e-2, rtol=2e-2), \
        "mismatch vs reference (bf16 / ragged)"

    print("KERNEL_OK")
</pallas_src>

<mosaic_0001>
module attributes {stable_mosaic.version = 11 : i64} {
  func.func @_layernorm_kernel(%arg0: i32, %arg1: memref<16x32xf32, #tpu.memory_space<vmem>>, %arg2: memref<1x32xf32, #tpu.memory_space<vmem>>, %arg3: memref<1x32xf32, #tpu.memory_space<vmem>>, %arg4: memref<16x32xf32, #tpu.memory_space<vmem>>) attributes {dimension_semantics = [#tpu.dimension_semantics<parallel>], iteration_bounds = array<i64: 1>, scalar_prefetch = 0 : i64, scratch_operands = 0 : i64, tpu.core_type = #tpu.core_type<tc>, window_params = [{transform_indices = @transform_0, window_bounds = array<i64: 16, 32>}, {pipeline_mode = #tpu.pipeline_mode<synchronous>, transform_indices = @transform_1, window_bounds = array<i64: 1, 32>}, {pipeline_mode = #tpu.pipeline_mode<synchronous>, transform_indices = @transform_2, window_bounds = array<i64: 1, 32>}, {transform_indices = @transform_3, window_bounds = array<i64: 16, 32>}]} {
    %c0 = arith.constant 0 : index
    %c0_0 = arith.constant 0 : index
    %0 = vector.load %arg1[%c0, %c0_0] : memref<16x32xf32, #tpu.memory_space<vmem>>, vector<16x32xf32>
    %cst = arith.constant dense<0.000000e+00> : vector<16xf32>
    %1 = vector.multi_reduction <add>, %0, %cst [1] : vector<16x32xf32> to vector<16xf32>
    %2 = vector.shape_cast %1 : vector<16xf32> to vector<16x1xf32>
    %cst_1 = arith.constant 3.200000e+01 : f32
    %3 = vector.broadcast %cst_1 : f32 to vector<16x1xf32>
    %4 = arith.divf %2, %3 : vector<16x1xf32>
    %5 = vector.broadcast %4 : vector<16x1xf32> to vector<16x32xf32>
    %6 = arith.subf %0, %5 : vector<16x32xf32>
    %7 = arith.mulf %6, %6 : vector<16x32xf32>
    %cst_2 = arith.constant dense<0.000000e+00> : vector<16xf32>
    %8 = vector.multi_reduction <add>, %7, %cst_2 [1] : vector<16x32xf32> to vector<16xf32>
    %9 = vector.shape_cast %8 : vector<16xf32> to vector<16x1xf32>
    %cst_3 = arith.constant 0.0322580636 : f32
    %10 = vector.broadcast %cst_3 : f32 to vector<16x1xf32>
    %11 = arith.mulf %9, %10 : vector<16x1xf32>
    %12 = math.sqrt %11 : vector<16x1xf32>
    %cst_4 = arith.constant 9.99999997E-7 : f32
    %13 = vector.broadcast %cst_4 : f32 to vector<16x1xf32>
    %14 = arith.addf %12, %13 : vector<16x1xf32>
    %15 = tpu.reciprocal %14 {approx = true} : vector<16x1xf32> -> vector<16x1xf32>
    %16 = arith.mulf %14, %15 : vector<16x1xf32>
    %cst_5 = arith.constant 2.000000e+00 : f32
    %17 = vector.broadcast %cst_5 : f32 to vector<16x1xf32>
    %18 = arith.subf %17, %16 : vector<16x1xf32>
    %19 = arith.mulf %15, %18 : vector<16x1xf32>
    %c0_6 = arith.constant 0 : index
    %c0_7 = arith.constant 0 : index
    %20 = vector.load %arg2[%c0_6, %c0_7] : memref<1x32xf32, #tpu.memory_space<vmem>>, vector<1x32xf32>
    %c0_8 = arith.constant 0 : index
    %c0_9 = arith.constant 0 : index
    %21 = vector.load %arg3[%c0_8, %c0_9] : memref<1x32xf32, #tpu.memory_space<vmem>>, vector<1x32xf32>
    %22 = vector.broadcast %19 : vector<16x1xf32> to vector<16x32xf32>
    %23 = arith.mulf %6, %22 : vector<16x32xf32>
    %24 = vector.broadcast %20 : vector<1x32xf32> to vector<16x32xf32>
    %25 = arith.mulf %24, %23 : vector<16x32xf32>
    %26 = vector.broadcast %21 : vector<1x32xf32> to vector<16x32xf32>
    %27 = arith.addf %25, %26 : vector<16x32xf32>
    %c0_10 = arith.constant 0 : index
    %c0_11 = arith.constant 0 : index
    %28 = vector.load %arg4[%c0_10, %c0_11] : memref<16x32xf32, #tpu.memory_space<vmem>>, vector<16x32xf32>
    tpu.vector_store %arg4[%c0_10, %c0_11], %27 {strides = array<i32>} : memref<16x32xf32, #tpu.memory_space<vmem>>, vector<16x32xf32>,
    return
  }
  func.func @transform_0(%arg0: i32) -> (i32, i32) {
    %c0_i32 = arith.constant 0 : i32
    %c0_i32_0 = arith.constant 0 : i32
    return %arg0, %c0_i32 : i32, i32
  }
  func.func @transform_1(%arg0: i32) -> (i32, i32) {
    %c0_i32 = arith.constant 0 : i32
    %c0_i32_0 = arith.constant 0 : i32
    %c0_i32_1 = arith.constant 0 : i32
    return %c0_i32, %c0_i32_0 : i32, i32
  }
  func.func @transform_2(%arg0: i32) -> (i32, i32) {
    %c0_i32 = arith.constant 0 : i32
    %c0_i32_0 = arith.constant 0 : i32
    %c0_i32_1 = arith.constant 0 : i32
    return %c0_i32, %c0_i32_0 : i32, i32
  }
  func.func @transform_3(%arg0: i32) -> (i32, i32) {
    %c0_i32 = arith.constant 0 : i32
    %c0_i32_0 = arith.constant 0 : i32
    return %arg0, %c0_i32 : i32, i32
  }
}

</mosaic_0001>

<bundles_post_ra>
// kernel: tpu_custom_call.1
= control target key start
LH: loop header
LB: loop body
LE: loop exit
PB: predicated region body
PF: predicated region fallthrough
CT: control target
= control target key end

     0   :  { %8 = vsyncpa [#allocation3], 0  ;;  %s291_s0 = inlined_call_operand.hbm [shape: f32[16,32], index: 0, kind: input, shape index: {}]   ;;  %s292_s1 = inlined_call_operand.hbm [shape: f32[1,32], index: 1, kind: input, shape index: {}]   ;;  %s293_s2 = inlined_call_operand.vmem [shape: f32[1,32], index: 2, kind: input, shape index: {}]   ;;  %s294_s3 = inlined_call_operand.hbm [shape: f32[16,32], index: 3, kind: output, shape index: {}]  }
   0x1   :  { %9 = vsyncpa [#allocation6], 0 }
   0x2   :  { %10 = vsyncpa [#allocation4], 0  ;;  %s15_s14 = sshll.u32 %s291_s0, 4  ;;  %s241_s15 = smov [#allocation2]   ;;  %s16_s14 = int_to_ptr.hbm [resolvable:$true] %s15_s14 }
   0x3   :  { %s17_s16 = sshll.u32 %s241_s15, 4  ;;  %s29_s19 = sshll.u32 %s292_s1, 4  ;;  %s18_s16 = int_to_ptr.vmem [resolvable:$true] %s17_s16  ;;  %s30_s19 = int_to_ptr.hbm [resolvable:$true] %s29_s19 }
   0x4   :  { %s242_s20 = smov 128   ;;  %s243_s21 = smov 8  }
   0x5   :  { %23 = dma.hbm_to_vmem [thread:$0]  %s16_s14, 256, %s18_s16, [#allocation3], %s242_s20, %s242_s20, %s243_s21  }
   0x6   :  { %s244_s22 = smov [#allocation5]  }
   0x7   :  { %s31_s23 = sshll.u32 %s244_s22, 4  ;;  %s32_s23 = int_to_ptr.vmem [resolvable:$true] %s31_s23 }
   0x8   :  { %34 = dma.hbm_to_vmem [thread:$0]  %s30_s19, 16, %s32_s23, [#allocation6]  }
   0x9   :  { %235 = dma.done.wait [#allocation3], 256  }
   0xa   :  { %236 = vsyncadd [#allocation3], 4294967040 }
   0xb   :  { %237 = dma.done.wait [#allocation6], 16  }
   0xc   :  { %238 = vsyncadd [#allocation6], 4294967280  ;;  %vm47_vm0 = vcmask 261120   ;;  %v45_v0 = vld [vmem:[#allocation2] sm:$0xff]  ;;  %v46_v2 = vld [vmem:[#allocation2 + $0x8] sm:$0xff]  ;;  %v245_v4 = vmov 32.0  }
   0xd   :  { %v48_v1 = vsel %vm47_vm0, %v45_v0, 0.0  ;;  %v51_v3 = vsel %vm47_vm0, %v46_v2, 0.0  ;;  %153 = vrcp.f32 %v245_v4  ;;  %v151_v51 = vld [vmem:[#allocation5] ss:$0 sm:$0xff]  ;;  %v152_v53 = vld [vmem:[%s293_s2] ss:$0 sm:$0xff] }
   0xe   :  { %49 = vadd.xlane.f32.xlu0 %v48_v1  ;;  %s246_s24 = smov [#allocation7]   ;;  %s131_s28 = sshll.u32 %s294_s3, 4  ;;  %s132_s28 = int_to_ptr.hbm [resolvable:$true] %s131_s28 }
   0xf   :  { %s129_s25 = sshll.u32 %s246_s24, 4  ;;  %s130_s25 = int_to_ptr.vmem [resolvable:$true] %s129_s25 }
  0x13   :  { %v154_v5 = vpop.eup %153 }
  0x14   :  { %v55_v6 = vmul.f32 32.0, %v154_v5  ;;  %vm59_vm1 = vweird.f32 %v154_v5 }
  0x16   :  { %52 = vadd.xlane.f32.xlu0 %v51_v3  ;;  %v56_v7 = vsub.f32 1.0, %v55_v6 }
  0x18   :  { %v57_v8 = vmul.f32 %v154_v5, %v56_v7 }
  0x1a   :  { %v58_v9 = vadd.f32 %v154_v5, %v57_v8 }
  0x1c   :  { %v60_v10 = vsel %vm59_vm1, %v154_v5, %v58_v9 }
  0x81   :  { %v50_v11 = vpop.xlane.xlu0 %49 }
  0x82   :  { %v61_v12 = vmul.f32 %v60_v10, %v50_v11 }
  0x84   :  { %v63_v13 = vsub.f32 %v45_v0, %v61_v12 }
  0x86   :  { %v65_v14 = vmul.f32 %v63_v13, %v63_v13 }
  0x88   :  { %v67_v15 = vsel %vm47_vm0, %v65_v14, 0.0 }
  0x89   :  { %68 = vadd.xlane.f32.xlu1 %v67_v15  ;;  %v53_v16 = vpop.xlane.xlu0 %52 }
  0x8a   :  { %v62_v17 = vmul.f32 %v60_v10, %v53_v16 }
  0x8c   :  { %v64_v18 = vsub.f32 %v46_v2, %v62_v17 }
  0x8e   :  { %v66_v19 = vmul.f32 %v64_v18, %v64_v18 }
  0x90   :  { %v70_v20 = vsel %vm47_vm0, %v66_v19, 0.0 }
  0x91   :  { %71 = vadd.xlane.f32.xlu1 %v70_v20 }
  0xfc   :  { %v69_v21 = vpop.xlane.xlu1 %68 }
  0xfd   :  { %v73_v22 = vmul.f32 0.032258064, %v69_v21 }
  0xff   :  { %155 = vrsqrt.f32 %v73_v22  ;;  %vm82_vm2 = vcmp.eq.f32.partialorder %v73_v22, inf  ;;  %v85_v35 = vand.u32 2147483648, %v73_v22  ;;  %vm84_vm3 = vcmp.eq.f32.partialorder %v73_v22, 0.0 }
 0x104   :  { %v72_v23 = vpop.xlane.xlu1 %71 }
 0x105   :  { %v156_v24 = vpop.eup %155  ;;  %v74_v25 = vmul.f32 0.032258064, %v72_v23 }
 0x106   :  { %v76_v26 = vmul.f32 %v156_v24, %v73_v22 }
 0x107   :  { %157 = vrsqrt.f32 %v74_v25  ;;  %vm94_vm4 = vcmp.eq.f32.partialorder %v74_v25, inf  ;;  %v97_v43 = vand.u32 2147483648, %v74_v25  ;;  %vm96_vm5 = vcmp.eq.f32.partialorder %v74_v25, 0.0 }
 0x108   :  { %v77_v27 = vmul.f32 %v156_v24, %v76_v26 }
 0x10a   :  { %v78_v28 = vmul.f32 0.5, %v77_v27 }
 0x10c   :  { %v79_v29 = vsub.f32 1.5, %v78_v28 }
 0x10d   :  { %v158_v30 = vpop.eup %157 }
 0x10e   :  { %v80_v31 = vmul.f32 %v156_v24, %v79_v29  ;;  %v88_v32 = vmul.f32 %v158_v30, %v74_v25 }
 0x110   :  { %v81_v33 = vmul.f32 %v80_v31, %v73_v22  ;;  %v89_v34 = vmul.f32 %v158_v30, %v88_v32 }
 0x112   :  { %v90_v36 = vmul.f32 0.5, %v89_v34  ;;  %v83_v37 = vsel %vm82_vm2, %v73_v22, %v81_v33 }
 0x113   :  { %v86_v38 = vsel %vm84_vm3, %v85_v35, %v83_v37 }
 0x114   :  { %v91_v39 = vsub.f32 1.5, %v90_v36  ;;  %v99_v40 = vadd.f32 1e-06, %v86_v38 }
 0x116   :  { %v92_v41 = vmul.f32 %v158_v30, %v91_v39  ;;  %159 = vrcp.f32 %v99_v40 }
 0x118   :  { %v93_v42 = vmul.f32 %v92_v41, %v74_v25 }
 0x11a   :  { %v95_v44 = vsel %vm94_vm4, %v74_v25, %v93_v42 }
 0x11b   :  { %v98_v45 = vsel %vm96_vm5, %v97_v43, %v95_v44 }
 0x11c   :  { %v160_v46 = vpop.eup %159  ;;  %v100_v47 = vadd.f32 1e-06, %v98_v45 }
 0x11d   :  { %v103_v48 = vmul.f32 %v160_v46, %v99_v40 }
 0x11e   :  { %161 = vrcp.f32 %v100_v47 }
 0x11f   :  { %v105_v49 = vsub.f32 2.0, %v103_v48 }
 0x121   :  { %v107_v50 = vmul.f32 %v160_v46, %v105_v49 }
 0x123   :  { %v111_v52 = vmul.f32 %v107_v50, %v63_v13 }
 0x124   :  { %v162_v54 = vpop.eup %161 }
 0x125   :  { %v104_v55 = vmul.f32 %v162_v54, %v100_v47  ;;  %v116_v56 = vmul.f32 %v151_v51, %v111_v52 }
 0x127   :  { %v106_v57 = vsub.f32 2.0, %v104_v55  ;;  %v121_v58 = vadd.f32 %v152_v53, %v116_v56 }
 0x129   :  { %v108_v59 = vmul.f32 %v162_v54, %v106_v57  ;;  %123 = vst.msk [vmem:[#allocation7] sm:$0xff] %vm47_vm0, %v121_v58 }
 0x12b   :  { %v112_v60 = vmul.f32 %v108_v59, %v64_v18 }
 0x12d   :  { %v117_v61 = vmul.f32 %v151_v51, %v112_v60 }
 0x12f   :  { %v122_v62 = vadd.f32 %v152_v53, %v117_v61 }
 0x131   :  { %124 = vst.msk [vmem:[#allocation7 + $0x8] sm:$0xff] %vm47_vm0, %v122_v62 }
 0x132   :  { %137 = dma.vmem_to_hbm [thread:$0]  %s130_s25, 256, %s132_s28, [#allocation4], %s242_s20, %s242_s20, %s243_s21  }
 0x133   :  { %239 = dma.done.wait [#allocation4], 256  }
 0x134   :  { %240 = vsyncadd [#allocation4], 4294967040 }
 0x135   :  { %142 = vsyncpa [#allocation3], 1 }
 0x136   :  { %143 = vsyncpa [#allocation6], 1 }
 0x137   :  { %144 = vsyncpa [#allocation4], 1 }

</bundles_post_ra>
